<compile_context>
chip_gen: v7x
topology: tpu7x:2x2x1
jax: 0.10.0
libtpu: 0.0.40
codegen_flags: <defaults>
</compile_context>

<pallas_src>
import jax
import jax.numpy as jnp
from jax.experimental import pallas as pl
from jax.experimental.pallas import tpu as pltpu


def _round_up(x, m):
    return (x + m - 1) // m * m


def cls_head_kernel(x_ref, w_ref, b_ref, o_ref):
    # x_ref: [tb, D]    CLS rows (f32 or bf16)
    # w_ref: [D, tn]    classification weight tile (f32 or bf16)
    # b_ref: [1, tn]    bias tile (f32)
    # o_ref: [tb, tn]   logits (f32), lane-dense (tn % 128 == 0)
    acc = jnp.dot(x_ref[...], w_ref[...], preferred_element_type=jnp.float32)
    o_ref[...] = (acc + b_ref[...]).astype(o_ref.dtype)


def prepare_classifier_params(w, b, *, compute_dtype=jnp.bfloat16):
    """One-time padding / casting of the classification head parameters.

    w: [D, L] (transposed torch Linear weight), b: [L].
    Hoisted out of the forward path so no per-call pad/cast HBM traffic.
    """
    D, L = w.shape
    Lpad = _round_up(max(L, 1), 128)
    wp = w if Lpad == L else jnp.pad(w, ((0, 0), (0, Lpad - L)))
    bp = b if Lpad == L else jnp.pad(b, ((0, Lpad - L),))
    return {
        "w_pad": wp.astype(compute_dtype),                  # [D, Lpad]
        "b_pad": bp.reshape(1, Lpad).astype(jnp.float32),   # [1, Lpad]
        "num_labels": L,
        "compute_dtype": compute_dtype,
    }


def _choose_tiles(B, D, Lpad, itemsize, *, tb_cap=512, tn_cap=512,
                  vmem_budget=28 * 1024 * 1024):
    """Pick (tb, tn) sublane/lane-aligned tiles under a VMEM budget."""
    tn = min(Lpad, tn_cap)
    if B <= 8:
        tb = max(B, 1)                      # full-batch block, single step
    else:
        # split the batch so v7x's two TensorCores both get >= 1 grid step
        tb = min(_round_up(pl.cdiv(B, 2), 8), tb_cap)

    def footprint(tb_):
        return (2 * tb_ * D * itemsize      # x tile (double buffered)
                + 2 * D * tn * itemsize     # weight tile
                + 2 * 8 * tn * 4            # bias tile (sublane-padded)
                + 2 * tb_ * tn * 4)         # output tile

    while tb > 8 and footprint(tb) > vmem_budget:
        tb = _round_up(tb // 2, 8)
    return tb, tn, footprint(tb)


def classification_head(cls_rep, head_params):
    """cls_rep: [B, D] -> logits [B, L] (f32)."""
    B, D = cls_rep.shape
    wp = head_params["w_pad"]
    b2 = head_params["b_pad"]
    L = head_params["num_labels"]
    compute_dtype = head_params["compute_dtype"]
    Lpad = wp.shape[1]
    itemsize = jnp.dtype(compute_dtype).itemsize

    tb, tn, vmem_est = _choose_tiles(B, D, Lpad, itemsize)
    grid = (pl.cdiv(B, tb), pl.cdiv(Lpad, tn))

    # bf16 MXU inputs on all chips (f32 accumulation kept inside the kernel).
    x = cls_rep.astype(compute_dtype)

    cost = pl.CostEstimate(
        flops=2 * B * D * Lpad,
        transcendentals=0,
        bytes_accessed=(B * D * itemsize + D * Lpad * itemsize
                        + Lpad * 4 + B * Lpad * 4),
    )

    out = pl.pallas_call(
        cls_head_kernel,
        out_shape=jax.ShapeDtypeStruct((B, Lpad), jnp.float32),
        grid_spec=pltpu.PrefetchScalarGridSpec(
            num_scalar_prefetch=0,
            grid=grid,
            in_specs=[
                pl.BlockSpec((tb, D), lambda i, j: (i, 0)),   # CLS rows
                pl.BlockSpec((D, tn), lambda i, j: (0, j)),   # weight tile
                pl.BlockSpec((1, tn), lambda i, j: (0, j)),   # bias tile
            ],
            out_specs=pl.BlockSpec((tb, tn), lambda i, j: (i, j)),
        ),
        compiler_params=pltpu.CompilerParams(
            dimension_semantics=("parallel", "parallel"),
            vmem_limit_bytes=int(min(max(2 * vmem_est + (2 << 20), 16 << 20),
                                     64 << 20)),
        ),
        cost_estimate=cost,
    )(x, wp, b2)

    return out[:, :L] if Lpad != L else out


def synthetic_sentence_rep(src, embed_table, lang_id=None):
    """Stand-in for the external sentence_rep_model (encoder).

    src: [B, S] int32 token ids -> ([B, S, D], None), matching the PyTorch
    submodule's (sentence_rep, _) convention.
    """
    rep = embed_table[src]  # [B, S, D]
    return rep, None


def classification_model_forward(src, params, head_params, lang_id=None):
    sentence_rep, _ = synthetic_sentence_rep(src, params["embed"], lang_id)
    # CLS slice in the wrapper: the kernel only ever DMAs [B, D].
    cls = sentence_rep[:, 0, :]
    # classification_dropout: identity in eval/inference mode.
    return classification_head(cls, head_params)


if __name__ == "__main__":
    # Small shapes consistent with the forward pass.
    B, S, D = 2, 8, 32          # batch, seq, sentence_rep_dim
    L = 8                        # num_label1
    VOCAB = 100
    PAD_INDEX = 0                # vocab.pad_index (unused in forward math)

    key = jax.random.PRNGKey(0)
    k_src, k_emb, k_w, k_b = jax.random.split(key, 4)

    src = jax.random.randint(k_src, (B, S), 0, VOCAB, dtype=jnp.int32)
    params = {
        "embed": jax.random.normal(k_emb, (VOCAB, D), dtype=jnp.float32) * 0.1,
        # nn.Linear(input_dim, num_label1): torch weight is [L, D]; stored
        # transposed [D, L] for x @ W.
        "w": jax.random.normal(k_w, (D, L), dtype=jnp.float32) * 0.1,
        "b": jax.random.normal(k_b, (L,), dtype=jnp.float32) * 0.1,
    }

    # One-time parameter preparation (padding / cast hoisted out of forward).
    head_f32 = prepare_classifier_params(params["w"], params["b"],
                                         compute_dtype=jnp.float32)
    head_bf16 = prepare_classifier_params(params["w"], params["b"],
                                          compute_dtype=jnp.bfloat16)

    # f32 path (bit-accurate vs the PyTorch-style reference).
    logits_f32 = classification_model_forward(src, params, head_f32)
    # bf16-input path (bf16 MXU on v5e/v6e/v7x; f32 accumulation).
    logits_bf16 = classification_model_forward(src, params, head_bf16)

    # Larger batch exercising the multi-step grid and the partial last block.
    B2 = 20
    src2 = jax.random.randint(jax.random.PRNGKey(1), (B2, S), 0, VOCAB,
                              dtype=jnp.int32)
    logits2 = classification_model_forward(src2, params, head_f32)

    logits_f32, logits_bf16, logits2 = jax.block_until_ready(
        (logits_f32, logits_bf16, logits2))

    # Reference in plain JAX (f32).
    def ref_forward(s):
        rep, _ = synthetic_sentence_rep(s, params["embed"])
        return rep[:, 0] @ params["w"] + params["b"]

    ref1 = ref_forward(src)
    ref2 = ref_forward(src2)

    assert logits_f32.shape == (B, L)
    assert logits_bf16.shape == (B, L)
    assert logits2.shape == (B2, L)
    assert jnp.allclose(logits_f32, ref1, atol=1e-5, rtol=1e-5)
    assert jnp.allclose(logits_bf16, ref1, atol=2e-2, rtol=2e-2)
    assert jnp.allclose(logits2, ref2, atol=1e-5, rtol=1e-5)

    print("KERNEL_OK")
</pallas_src>

<mosaic_0001>
module attributes {stable_mosaic.version = 11 : i64} {
  func.func @cls_head_kernel(%arg0: i32, %arg1: i32, %arg2: memref<2x32xf32, #tpu.memory_space<vmem>>, %arg3: memref<32x128xf32, #tpu.memory_space<vmem>>, %arg4: memref<1x128xf32, #tpu.memory_space<vmem>>, %arg5: memref<2x128xf32, #tpu.memory_space<vmem>>) attributes {dimension_semantics = [#tpu.dimension_semantics<parallel>, #tpu.dimension_semantics<parallel>], iteration_bounds = array<i64: 1, 1>, scalar_prefetch = 0 : i64, scratch_operands = 0 : i64, tpu.core_type = #tpu.core_type<tc>, window_params = [{transform_indices = @transform_0, window_bounds = array<i64: 2, 32>}, {transform_indices = @transform_1, window_bounds = array<i64: 32, 128>}, {transform_indices = @transform_2, window_bounds = array<i64: 1, 128>}, {transform_indices = @transform_3, window_bounds = array<i64: 2, 128>}]} {
    %c0 = arith.constant 0 : index
    %c0_0 = arith.constant 0 : index
    %0 = vector.load %arg2[%c0, %c0_0] : memref<2x32xf32, #tpu.memory_space<vmem>>, vector<2x32xf32>
    %c0_1 = arith.constant 0 : index
    %c0_2 = arith.constant 0 : index
    %1 = vector.load %arg3[%c0_1, %c0_2] : memref<32x128xf32, #tpu.memory_space<vmem>>, vector<32x128xf32>
    %cst = arith.constant dense<0.000000e+00> : vector<2x128xf32>
    %2 = tpu.matmul %0, %1, %cst {dimension_numbers = #tpu.dot_dimension_numbers<[1], [0], [0], [1], [0, 0, 1, 1], [], []>} : vector<2x32xf32>, vector<32x128xf32>, vector<2x128xf32> -> vector<2x128xf32>
    %c0_3 = arith.constant 0 : index
    %c0_4 = arith.constant 0 : index
    %3 = vector.load %arg4[%c0_3, %c0_4] : memref<1x128xf32, #tpu.memory_space<vmem>>, vector<1x128xf32>
    %4 = vector.broadcast %3 : vector<1x128xf32> to vector<2x128xf32>
    %5 = arith.addf %2, %4 : vector<2x128xf32>
    %c0_5 = arith.constant 0 : index
    %c0_6 = arith.constant 0 : index
    %6 = vector.load %arg5[%c0_5, %c0_6] : memref<2x128xf32, #tpu.memory_space<vmem>>, vector<2x128xf32>
    tpu.vector_store %arg5[%c0_5, %c0_6], %5 {strides = array<i32>} : memref<2x128xf32, #tpu.memory_space<vmem>>, vector<2x128xf32>,
    return
  }
  func.func @transform_0(%arg0: i32, %arg1: i32) -> (i32, i32) {
    %c0_i32 = arith.constant 0 : i32
    %c0_i32_0 = arith.constant 0 : i32
    return %arg0, %c0_i32 : i32, i32
  }
  func.func @transform_1(%arg0: i32, %arg1: i32) -> (i32, i32) {
    %c0_i32 = arith.constant 0 : i32
    %c0_i32_0 = arith.constant 0 : i32
    return %c0_i32, %arg1 : i32, i32
  }
  func.func @transform_2(%arg0: i32, %arg1: i32) -> (i32, i32) {
    %c0_i32 = arith.constant 0 : i32
    %c0_i32_0 = arith.constant 0 : i32
    return %c0_i32, %arg1 : i32, i32
  }
  func.func @transform_3(%arg0: i32, %arg1: i32) -> (i32, i32) {
    %c0_i32 = arith.constant 0 : i32
    return %arg0, %arg1 : i32, i32
  }
}

</mosaic_0001>

<bundles_post_ra>
// kernel: tpu_custom_call.1
= control target key start
LH: loop header
LB: loop body
LE: loop exit
PB: predicated region body
PF: predicated region fallthrough
CT: control target
= control target key end

     0   :  { %8 = vsyncpa [#allocation3], 0  ;;  %s322_s0 = inlined_call_operand.hbm [shape: f32[2,32], index: 0, kind: input, shape index: {}]   ;;  %s323_s1 = inlined_call_operand.hbm [shape: f32[32,128], index: 1, kind: input, shape index: {}]   ;;  %s324_s2 = inlined_call_operand.vmem [shape: f32[1,128], index: 2, kind: input, shape index: {}]   ;;  %s325_s3 = inlined_call_operand.hbm [shape: f32[2,128], index: 3, kind: output, shape index: {}]  }
   0x1   :  { %9 = vsyncpa [#allocation6], 0 }
   0x2   :  { %10 = vsyncpa [#allocation4], 0  ;;  %s248_s12 = smov [#allocation2]   ;;  %s249_s14 = smov [#allocation5]  }
   0x3   :  { %s17_s13 = sshll.u32 %s248_s12, 4  ;;  %s26_s15 = sshll.u32 %s249_s14, 4  ;;  %s18_s13 = int_to_ptr.vmem [resolvable:$true] %s17_s13  ;;  %s276_s15 = int_to_ptr.vmem [resolvable:$true] %s26_s15 }
   0x4   :  { %s176_s18 = scalar_lea.hbm %s322_s0, 32 }
   0x5   :  { %p177_p0 = scmp.ne.s32.totalorder %s322_s0, %s176_s18  ;;  %p180_p1 = scmp.lt.u32.totalorder %s176_s18, %s322_s0 }
   0x7   :  { %p182_p2 = pnand %p180_p1, %p177_p0 }
   0x9   :  { %185 = shalt.err (!%p182_p2)
}
   0xa   :  { %s186_s23 = scalar_lea.vmem %s18_s13, 32  ;;  %p191_p4 = scmp.lt.s32.totalorder %s18_s13, %s18_s13 }
   0xb   :  { %p187_p3 = scmp.ne.s32.totalorder %s18_s13, %s186_s23  ;;  %p192_p5 = scmp.lt.s32.totalorder %s186_s23, %s186_s23 }
   0xd   :  { %p193_p6 = por %p192_p5, %p191_p4 }
   0xf   :  { %p194_p7 = pnand %p193_p6, %p187_p3 }
  0x11   :  { %197 = shalt.err (!%p194_p7)
}
  0x12   :  { %20 = dma.hbm_to_vmem [thread:$0]  %s322_s0, 32, %s18_s13, [#allocation3]  }
  0x13   :  { %s198_s28 = scalar_lea.hbm %s323_s1, 512 }
  0x14   :  { %p199_p8 = scmp.ne.s32.totalorder %s323_s1, %s198_s28  ;;  %p202_p9 = scmp.lt.u32.totalorder %s198_s28, %s323_s1 }
  0x16   :  { %p204_p10 = pnand %p202_p9, %p199_p8 }
  0x18   :  { %207 = shalt.err (!%p204_p10)
}
  0x19   :  { %s208_s6 = scalar_lea.vmem %s276_s15, 512  ;;  %p213_p12 = scmp.lt.s32.totalorder %s276_s15, %s276_s15 }
  0x1a   :  { %p209_p11 = scmp.ne.s32.totalorder %s276_s15, %s208_s6  ;;  %p214_p13 = scmp.lt.s32.totalorder %s208_s6, %s208_s6 }
  0x1c   :  { %p215_p0 = por %p214_p13, %p213_p12 }
  0x1e   :  { %p216_p1 = pnand %p215_p0, %p209_p11 }
  0x20   :  { %219 = shalt.err (!%p216_p1)
}
  0x21   :  { %s250_s0 = smov 128   ;;  %s251_s7 = smov 8  }
  0x22   :  { %32 = dma.hbm_to_vmem [thread:$0]  %s323_s1, 512, %s276_s15, [#allocation6], %s250_s0, %s250_s0, %s251_s7  }
  0x23   :  { %242 = dma.done.wait [#allocation3], 32  }
  0x24   :  { %243 = vsyncadd [#allocation3], 4294967264 }
  0x25   :  { %244 = dma.done.wait [#allocation6], 512  }
  0x26   :  { %245 = vsyncadd [#allocation6], 4294966784  ;;  %v252_v0 = vmov 0.0|0.0   ;;  %vm253_vm0 = vmmov 0   ;;  %v254_v1 = vmov 0.0   ;;  %v42_v2 = vld [vmem:[#allocation5] sm:$0xff] }
  0x27   :  { %162 = vmatprep.subr.bf16.mxu0 %v252_v0  ;;  %159 = vmatprep.mubr.msk.f32.mxu0 %vm253_vm0, %v254_v1  ;;  %v43_v3 = vld [vmem:[#allocation5 + $0x8] sm:$0xff]  ;;  %v44_v4 = vld [vmem:[#allocation5 + $0x10] sm:$0xff]  ;;  %v45_v6 = vld [vmem:[#allocation5 + $0x18] sm:$0xff]  ;;  %vm53_vm1 = vcmask 261120   ;;  %s255_s11 = smov [#allocation7]  }
  0x28   :  { %v163_v5 = vpack.c.bf16 %v43_v3, %v42_v2  ;;  %v166_v7 = vpack.c.bf16 %v45_v6, %v44_v4  ;;  %v41_v8 = vld [vmem:[#allocation2] sm:$0x3]  ;;  %s134_s12 = sshll.u32 %s255_s11, 4  ;;  %s135_s12 = int_to_ptr.vmem [resolvable:$true] %s134_s12 }
  0x29   :  { %v144_v9 = vld [vmem:[%s324_s2] ss:$0 sm:$0xff]  ;;  %s220_s13 = scalar_lea.vmem %s135_s12, 32  ;;  %p225_p3 = scmp.lt.s32.totalorder %s135_s12, %s135_s12 }
  0x2a   :  { %164 = vmatpush3.bf16.msra.mxu0 %v163_v5  ;;  %p221_p2 = scmp.ne.s32.totalorder %s135_s12, %s220_s13  ;;  %p226_p4 = scmp.lt.s32.totalorder %s220_s13, %s220_s13 }
  0x2b   :  { %165 = vmatprep.subr.bf16.mxu0 %v252_v0 }
  0x2c   :  { %p227_p5 = por %p226_p4, %p225_p3 }
  0x2e   :  { %167 = vmatpush3.bf16.msra.mxu0 %v166_v7  ;;  %p228_p6 = pnand %p227_p5, %p221_p2 }
  0x31   :  { %160 = vmatmul.mubr.msk.f32.vlgmr.msra.gmra.mrb[0].mxu0 %vm53_vm1, %v41_v8 }
 0x104   :  { %v123_v10 = vpop.f32.mrb[0].mxu0 }
 0x105   :  { %v124_v11 = vadd.f32 %v144_v9, %v123_v10  ;;  %v161_v12 = vpop.f32.mrb[1].mxu0 }
 0x107   :  { %127 = vst [vmem:[#allocation7] sm:$0x3] %v124_v11 }
 0x108   :  { %231 = shalt.err (!%p228_p6)
}
 0x109   :  { %s232_s16 = scalar_lea.hbm %s325_s3, 32 }
 0x10a   :  { %p233_p7 = scmp.ne.s32.totalorder %s325_s3, %s232_s16  ;;  %p236_p8 = scmp.lt.u32.totalorder %s232_s16, %s325_s3 }
 0x10c   :  { %p238_p9 = pnand %p236_p8, %p233_p7 }
 0x10e   :  { %241 = shalt.err (!%p238_p9)
}
 0x10f   :  { %137 = dma.vmem_to_hbm [thread:$0]  %s135_s12, 32, %s325_s3, [#allocation4]  }
 0x110   :  { %246 = dma.done.wait [#allocation4], 32  }
 0x111   :  { %247 = vsyncadd [#allocation4], 4294967264 }
 0x112   :  { %141 = vsyncpa [#allocation3], 1 }
 0x113   :  { %142 = vsyncpa [#allocation6], 1 }
 0x114   :  { %143 = vsyncpa [#allocation4], 1 }

</bundles_post_ra>
